<compile_context>
chip_gen: v7x
topology: tpu7x:2x2x1
jax: 0.10.0
libtpu: 0.0.40
codegen_flags: <defaults>
</compile_context>

<pallas_src>
import numpy as np
import jax
import jax.numpy as jnp
from jax import lax
from jax.experimental import pallas as pl
from jax.experimental.pallas import tpu as pltpu

# Model hyper-params implied by the PyTorch module:
#   conv2 output must flatten to 160 = 10 * 4 * 4  =>  width = height = 8
WIDTH = HEIGHT = 8
HW = HEIGHT * WIDTH          # 64
NR_ACTIONS = 1
CMD_DIM = 9
KNIGHT_X = np.array([0, 2, 1, -1, -2, -2, -1, 1, 2], np.float32)
KNIGHT_Y = np.array([0, 1, 2, 2, 1, -1, -2, -2, -1], np.float32)

# Padded (lane / MXU aligned) feature widths.
D0 = 2 * HW       # 128  merged conv1 input  (img_1 | img_2)
D1 = 256          # conv1 flatten: 6*6*6 = 216  -> 256
D2 = 256          # conv2 flatten: 10*4*4 = 160 -> 256
D3 = 128          # lin1 out: 128 (already aligned)
D4 = 128          # lin2 out: 64  -> 128
D5 = 128          # logits:   9   -> 128
OUT_LANES = 8     # narrow output: [x_val, y_val, 1.0, 0, 0, 0, 0, 0]
NEG_INF = -1e30   # padded-logit bias so exp() underflows to exactly 0

MAX_BATCH_TILE = 1024   # rows per grid step (footprint stays far below VMEM limits)


def _round_up(n, m):
    return ((n + m - 1) // m) * m


def _uniform(rng, shape, fan_in):
    bound = 1.0 / np.sqrt(fan_in)
    return rng.uniform(-bound, bound, size=shape).astype(np.float32)


def init_params(seed=0):
    """Deterministic synthetic parameters with PyTorch-default-like ranges."""
    rng = np.random.default_rng(seed)
    p = {}
    p["conv1_w"] = _uniform(rng, (6, 2, 3, 3), 2 * 9)     # Conv2d(2, 6, 3)  (OIHW)
    p["conv1_b"] = _uniform(rng, (6,), 2 * 9)
    p["conv2_w"] = _uniform(rng, (10, 6, 3, 3), 6 * 9)    # Conv2d(6, 10, 3)
    p["conv2_b"] = _uniform(rng, (10,), 6 * 9)
    # lin_img_1 / lin_img_2 exist in __init__ but are never used in forward();
    # they are dead parameters and intentionally omitted here.
    p["lin1_w"] = _uniform(rng, (128, 160), 160)          # Linear(160, 128) (out, in)
    p["lin1_b"] = _uniform(rng, (128,), 160)
    p["lin2_w"] = _uniform(rng, (64, 128), 128)           # Linear(128, 64)
    p["lin2_b"] = _uniform(rng, (64,), 128)
    p["lin3_w"] = _uniform(rng, (CMD_DIM * NR_ACTIONS, 64), 64)  # Linear(64, 9)
    p["lin3_b"] = _uniform(rng, (CMD_DIM * NR_ACTIONS,), 64)
    return p


def conv_as_matrix(w, b, in_c, in_h, in_w):
    """Valid 2D conv (OIHW weights) as a dense (C*H*W, OC*OH*OW) matrix.

    Input/output flatten orders are NCHW (c-major, then h, then w), exactly what
    PyTorch's `.reshape(-1, OC*OH*OW)` produces.
    """
    oc, ic, kh, kw = w.shape
    oh, ow = in_h - kh + 1, in_w - kw + 1
    m = np.zeros((in_c * in_h * in_w, oc * oh * ow), np.float32)
    for o in range(oc):
        for i in range(oh):
            for j in range(ow):
                col = (o * oh + i) * ow + j
                for c in range(ic):
                    for a in range(kh):
                        for bb in range(kw):
                            row = (c * in_h + (i + a)) * in_w + (j + bb)
                            m[row, col] = w[o, c, a, bb]
    bias_full = np.repeat(b, oh * ow).astype(np.float32)
    return m, bias_full


def _pad2(a, rows, cols):
    out = np.zeros((rows, cols), np.float32)
    out[: a.shape[0], : a.shape[1]] = a
    return out


def make_prepared_params(params, compute_dtype=jnp.bfloat16):
    """One-time host-side parameter preparation (Toeplitz, transpose, pad, cast)."""
    m1, b1 = conv_as_matrix(params["conv1_w"], params["conv1_b"], 2, HEIGHT, WIDTH)           # (128, 216)
    m2, b2 = conv_as_matrix(params["conv2_w"], params["conv2_b"], 6, HEIGHT - 2, WIDTH - 2)   # (216, 160)

    # Merged conv1 Toeplitz: rows 0..63 multiply img_1 lanes, rows 64..127 img_2 lanes.
    m1p = _pad2(m1, D0, D1)                    # (128, 256)
    m2p = _pad2(m2, D1, D2)                    # (256, 256); zero rows for padded h1 lanes

    w1 = _pad2(params["lin1_w"].T, D2, D3)     # (160,128) -> (256,128)
    w2 = _pad2(params["lin2_w"].T, D3, D4)     # (128, 64) -> (128,128)
    w3 = _pad2(params["lin3_w"].T, D4, D5)     # (64,  9)  -> (128,128)

    # All per-layer biases consolidated into a single (8, 256) f32 ref:
    #   row 0: conv1 bias (216)   row 1: conv2 bias (160)
    #   row 2: lin1 bias (128)    row 3: lin2 bias (64)
    #   row 4: lin3 bias (9) with -1e30 on padded logit lanes 9..127
    bias = np.zeros((8, 256), np.float32)
    bias[0, : b1.shape[0]] = b1
    bias[1, : b2.shape[0]] = b2
    bias[2, :128] = params["lin1_b"]
    bias[3, :64] = params["lin2_b"]
    bias[4, :D5] = NEG_INF
    bias[4, : CMD_DIM * NR_ACTIONS] = params["lin3_b"]

    # Expectation matrix with the softmax denominator folded in:
    #   col 0 = knight_x, col 1 = knight_y, col 2 = ones  =>  e @ K also yields sum(e).
    k = np.zeros((D5, OUT_LANES), np.float32)
    k[:CMD_DIM, 0] = KNIGHT_X
    k[:CMD_DIM, 1] = KNIGHT_Y
    k[:CMD_DIM, 2] = 1.0

    return dict(
        m1=jnp.asarray(m1p, compute_dtype),
        m2=jnp.asarray(m2p, compute_dtype),
        w1=jnp.asarray(w1, compute_dtype),
        w2=jnp.asarray(w2, compute_dtype),
        w3=jnp.asarray(w3, compute_dtype),
        bias=jnp.asarray(bias),
        k=jnp.asarray(k),
    )


def img_controller_kernel(x1_ref, x2_ref,
                          m1_ref, m2_ref, w1_ref, w2_ref, w3_ref,
                          bias_ref, k_ref, out_ref):
    cdt = m1_ref.dtype             # compute dtype for MXU operands (bf16)
    f32 = jnp.float32

    # Pack the two 64-lane image rows into one lane-dense (TB, 128) MXU operand
    # (VMEM-local; no XLA concat pass) -> a single K=128 conv1 matmul.
    x = jnp.concatenate([x1_ref[...], x2_ref[...]], axis=-1).astype(cdt)     # (TB, 128)

    b1 = bias_ref[0:1, :]          # (1, 256) conv1 bias
    b2 = bias_ref[1:2, :]          # (1, 256) conv2 bias
    c1 = bias_ref[2:3, :D3]        # (1, 128) lin1 bias
    c2 = bias_ref[3:4, :D4]        # (1, 128) lin2 bias
    c3 = bias_ref[4:5, :D5]        # (1, 128) lin3 bias (-1e30 on padded lanes)

    # conv1 (Toeplitz) + ReLU
    h1 = jnp.dot(x, m1_ref[...], preferred_element_type=f32) + b1
    h1 = jnp.maximum(h1, 0.0).astype(cdt)                                    # (TB, 256)

    # conv2 + ReLU
    h2 = jnp.dot(h1, m2_ref[...], preferred_element_type=f32) + b2
    h2 = jnp.maximum(h2, 0.0).astype(cdt)                                    # (TB, 256)

    # lin1 + ReLU
    a1 = jnp.dot(h2, w1_ref[...], preferred_element_type=f32) + c1
    a1 = jnp.maximum(a1, 0.0).astype(cdt)                                    # (TB, 128)

    # lin2 + ReLU
    a2 = jnp.dot(a1, w2_ref[...], preferred_element_type=f32) + c2
    a2 = jnp.maximum(a2, 0.0).astype(cdt)                                    # (TB, 128)

    # lin3: full 128-lane logits; padded lanes carry the -1e30 bias.
    logits = jnp.dot(a2, w3_ref[...], preferred_element_type=f32) + c3       # (TB, 128)

    # Softmax expectation.  exp() of the padded lanes underflows to exactly 0,
    # and the ones column of K folds the denominator into the same MXU op:
    #   num[:, 0] = e @ knight_x,  num[:, 1] = e @ knight_y,  num[:, 2] = sum(e).
    mx = jnp.max(logits, axis=-1, keepdims=True)
    e = jnp.exp(logits - mx)
    num = jnp.dot(e, k_ref[...], preferred_element_type=f32)                 # (TB, 8)
    out_ref[...] = num * pl.reciprocal(num[:, 2:3], approx=True)             # narrow (TB, 8)


def img_controller_forward(img_1, img_2, prep):
    """Pallas forward.  Returns (B, NR_ACTIONS, 2) like the PyTorch module."""
    b = img_1.shape[0]
    x1 = img_1.reshape(b, HW)      # free reshape; dtype kept (cast happens in-kernel)
    x2 = img_2.reshape(b, HW)

    # Tiny batches only: pad to one full 8-row sublane group so a block is never
    # larger than the array.  For b >= 8 there is NO padding pass: the (possibly
    # ragged) last block relies on Pallas boundary handling -- rows are fully
    # independent, and out-of-bounds output rows are dropped.
    b_run = b
    if b < 8:
        x1 = jnp.pad(x1, ((0, 8 - b), (0, 0)))
        x2 = jnp.pad(x2, ((0, 8 - b), (0, 0)))
        b_run = 8

    # Batch tile: as large as possible (amortize per-step overhead) while keeping
    # >= 2 grid steps so the "parallel" batch axis can shard across v7x's two
    # TensorCores.  tb is sublane-aligned (multiple of 8).
    tb = min(MAX_BATCH_TILE, _round_up((b_run + 1) // 2, 8))
    grid = (pl.cdiv(b_run, tb),)

    row = lambda i: (i, 0)     # batch-tiled operands
    res = lambda i: (0, 0)     # weights/biases: same block every step -> VMEM-resident

    in_specs = [
        pl.BlockSpec((tb, HW), row),          # x1 rows
        pl.BlockSpec((tb, HW), row),          # x2 rows
        pl.BlockSpec((D0, D1), res),          # merged conv1 Toeplitz
        pl.BlockSpec((D1, D2), res),          # conv2 Toeplitz
        pl.BlockSpec((D2, D3), res),          # lin1
        pl.BlockSpec((D3, D4), res),          # lin2
        pl.BlockSpec((D4, D5), res),          # lin3
        pl.BlockSpec((8, 256), res),          # consolidated biases
        pl.BlockSpec((D5, OUT_LANES), res),   # expectation matrix (with ones column)
    ]
    out_specs = pl.BlockSpec((tb, OUT_LANES), row)

    out = pl.pallas_call(
        img_controller_kernel,
        out_shape=jax.ShapeDtypeStruct((b_run, OUT_LANES), jnp.float32),
        grid=grid,
        in_specs=in_specs,
        out_specs=out_specs,
        compiler_params=pltpu.CompilerParams(
            dimension_semantics=("parallel",),      # megacore sharding on v7x
            vmem_limit_bytes=32 * 1024 * 1024,      # explicit; footprint is a few MB
        ),
    )(x1, x2, prep["m1"], prep["m2"], prep["w1"], prep["w2"], prep["w3"],
      prep["bias"], prep["k"])

    # Narrow output: column 0 = x_val, column 1 = y_val.
    return out[:b, :2].reshape(b, NR_ACTIONS, 2)


def reference_forward(img_1, img_2, params):
    """Pure-JAX f32 replica of the PyTorch forward (NCHW), for verification."""
    x = jnp.stack([img_1, img_2], axis=1)                               # (B, 2, H, W)

    def conv(v, w, bb):
        y = lax.conv_general_dilated(v, jnp.asarray(w), (1, 1), "VALID",
                                     dimension_numbers=("NCHW", "OIHW", "NCHW"),
                                     precision=lax.Precision.HIGHEST)
        return y + jnp.asarray(bb)[None, :, None, None]

    h = jnp.maximum(conv(x, params["conv1_w"], params["conv1_b"]), 0.0)
    h = jnp.maximum(conv(h, params["conv2_w"], params["conv2_b"]), 0.0)
    flat = h.reshape(-1, 160)

    def lin(v, w, bb):
        return v @ jnp.asarray(w).T + jnp.asarray(bb)

    x1 = jnp.maximum(lin(flat, params["lin1_w"], params["lin1_b"]), 0.0)
    x2 = jnp.maximum(lin(x1, params["lin2_w"], params["lin2_b"]), 0.0)
    x3 = lin(x2, params["lin3_w"], params["lin3_b"])
    cmd = x3.reshape(-1, NR_ACTIONS, CMD_DIM)
    p = jax.nn.softmax(cmd, axis=2)
    xv = jnp.sum(p * jnp.asarray(KNIGHT_X), axis=2, keepdims=True)
    yv = jnp.sum(p * jnp.asarray(KNIGHT_Y), axis=2, keepdims=True)
    return jnp.concatenate([xv, yv], axis=2)


if __name__ == "__main__":
    params = init_params(seed=0)
    prep = make_prepared_params(params)              # one-time host-side prep
    fwd = jax.jit(img_controller_forward)

    base_key = jax.random.PRNGKey(0)
    # B=2  : the small requested shape (tiny-batch path, single grid step).
    # B=100: ragged last block (tb=56, grid=2) -- exercises the no-padding path.
    # B=384: exact two-step grid (tb=192) -- exercises megacore-style splitting.
    for B in (2, 100, 384):
        k1, k2 = jax.random.split(jax.random.fold_in(base_key, B))
        img_1 = jax.random.normal(k1, (B, HEIGHT, WIDTH), jnp.float32)
        img_2 = jax.random.normal(k2, (B, HEIGHT, WIDTH), jnp.float32)

        out = jax.block_until_ready(fwd(img_1, img_2, prep))
        ref = jax.block_until_ready(reference_forward(img_1, img_2, params))

        assert out.shape == (B, NR_ACTIONS, 2), out.shape
        np.testing.assert_allclose(np.asarray(out), np.asarray(ref), rtol=2e-2, atol=2e-2)

    print("KERNEL_OK")
</pallas_src>

<mosaic_0001>
module attributes {stable_mosaic.version = 11 : i64} {
  func.func @img_controller_kernel(%arg0: i32, %arg1: memref<8x64xf32, #tpu.memory_space<vmem>>, %arg2: memref<8x64xf32, #tpu.memory_space<vmem>>, %arg3: memref<128x256xbf16, #tpu.memory_space<vmem>>, %arg4: memref<256x256xbf16, #tpu.memory_space<vmem>>, %arg5: memref<256x128xbf16, #tpu.memory_space<vmem>>, %arg6: memref<128x128xbf16, #tpu.memory_space<vmem>>, %arg7: memref<128x128xbf16, #tpu.memory_space<vmem>>, %arg8: memref<8x256xf32, #tpu.memory_space<vmem>>, %arg9: memref<128x8xf32, #tpu.memory_space<vmem>>, %arg10: memref<8x8xf32, #tpu.memory_space<vmem>>) attributes {dimension_semantics = [#tpu.dimension_semantics<parallel>], iteration_bounds = array<i64: 1>, scalar_prefetch = 0 : i64, scratch_operands = 0 : i64, tpu.core_type = #tpu.core_type<tc>, window_params = [{transform_indices = @transform_0, window_bounds = array<i64: 8, 64>}, {transform_indices = @transform_1, window_bounds = array<i64: 8, 64>}, {pipeline_mode = #tpu.pipeline_mode<synchronous>, transform_indices = @transform_2, window_bounds = array<i64: 128, 256>}, {pipeline_mode = #tpu.pipeline_mode<synchronous>, transform_indices = @transform_3, window_bounds = array<i64: 256, 256>}, {pipeline_mode = #tpu.pipeline_mode<synchronous>, transform_indices = @transform_4, window_bounds = array<i64: 256, 128>}, {pipeline_mode = #tpu.pipeline_mode<synchronous>, transform_indices = @transform_5, window_bounds = array<i64: 128, 128>}, {pipeline_mode = #tpu.pipeline_mode<synchronous>, transform_indices = @transform_6, window_bounds = array<i64: 128, 128>}, {pipeline_mode = #tpu.pipeline_mode<synchronous>, transform_indices = @transform_7, window_bounds = array<i64: 8, 256>}, {pipeline_mode = #tpu.pipeline_mode<synchronous>, transform_indices = @transform_8, window_bounds = array<i64: 128, 8>}, {transform_indices = @transform_9, window_bounds = array<i64: 8, 8>}]} {
    %c0 = arith.constant 0 : index
    %c0_0 = arith.constant 0 : index
    %0 = vector.load %arg1[%c0, %c0_0] : memref<8x64xf32, #tpu.memory_space<vmem>>, vector<8x64xf32>
    %c0_1 = arith.constant 0 : index
    %c0_2 = arith.constant 0 : index
    %1 = vector.load %arg2[%c0_1, %c0_2] : memref<8x64xf32, #tpu.memory_space<vmem>>, vector<8x64xf32>
    %2 = tpu.concatenate %0, %1 in 1 : vector<8x64xf32>, vector<8x64xf32> -> vector<8x128xf32>
    %3 = arith.truncf %2 : vector<8x128xf32> to vector<8x128xbf16>
    %c0_3 = arith.constant 0 : index
    %c0_4 = arith.constant 0 : index
    %4 = vector.load %arg8[%c0_3, %c0_4] : memref<8x256xf32, #tpu.memory_space<vmem>>, vector<1x256xf32>
    %c1 = arith.constant 1 : index
    %c0_5 = arith.constant 0 : index
    %5 = vector.load %arg8[%c1, %c0_5] : memref<8x256xf32, #tpu.memory_space<vmem>>, vector<1x256xf32>
    %c2 = arith.constant 2 : index
    %c0_6 = arith.constant 0 : index
    %6 = vector.load %arg8[%c2, %c0_6] : memref<8x256xf32, #tpu.memory_space<vmem>>, vector<1x128xf32>
    %c3 = arith.constant 3 : index
    %c0_7 = arith.constant 0 : index
    %7 = vector.load %arg8[%c3, %c0_7] : memref<8x256xf32, #tpu.memory_space<vmem>>, vector<1x128xf32>
    %c4 = arith.constant 4 : index
    %c0_8 = arith.constant 0 : index
    %8 = vector.load %arg8[%c4, %c0_8] : memref<8x256xf32, #tpu.memory_space<vmem>>, vector<1x128xf32>
    %c0_9 = arith.constant 0 : index
    %c0_10 = arith.constant 0 : index
    %9 = vector.load %arg3[%c0_9, %c0_10] : memref<128x256xbf16, #tpu.memory_space<vmem>>, vector<128x256xbf16>
    %cst = arith.constant dense<0.000000e+00> : vector<8x256xf32>
    %10 = tpu.matmul %3, %9, %cst {dimension_numbers = #tpu.dot_dimension_numbers<[1], [0], [0], [1], [0, 0, 1, 1], [], []>} : vector<8x128xbf16>, vector<128x256xbf16>, vector<8x256xf32> -> vector<8x256xf32>
    %11 = vector.broadcast %4 : vector<1x256xf32> to vector<8x256xf32>
    %12 = arith.addf %10, %11 : vector<8x256xf32>
    %cst_11 = arith.constant 0.000000e+00 : f32
    %13 = vector.broadcast %cst_11 : f32 to vector<8x256xf32>
    %14 = arith.maximumf %12, %13 : vector<8x256xf32>
    %15 = arith.truncf %14 : vector<8x256xf32> to vector<8x256xbf16>
    %c0_12 = arith.constant 0 : index
    %c0_13 = arith.constant 0 : index
    %16 = vector.load %arg4[%c0_12, %c0_13] : memref<256x256xbf16, #tpu.memory_space<vmem>>, vector<256x256xbf16>
    %cst_14 = arith.constant dense<0.000000e+00> : vector<8x256xf32>
    %17 = tpu.matmul %15, %16, %cst_14 {dimension_numbers = #tpu.dot_dimension_numbers<[1], [0], [0], [1], [0, 0, 1, 1], [], []>} : vector<8x256xbf16>, vector<256x256xbf16>, vector<8x256xf32> -> vector<8x256xf32>
    %18 = vector.broadcast %5 : vector<1x256xf32> to vector<8x256xf32>
    %19 = arith.addf %17, %18 : vector<8x256xf32>
    %cst_15 = arith.constant 0.000000e+00 : f32
    %20 = vector.broadcast %cst_15 : f32 to vector<8x256xf32>
    %21 = arith.maximumf %19, %20 : vector<8x256xf32>
    %22 = arith.truncf %21 : vector<8x256xf32> to vector<8x256xbf16>
    %c0_16 = arith.constant 0 : index
    %c0_17 = arith.constant 0 : index
    %23 = vector.load %arg5[%c0_16, %c0_17] : memref<256x128xbf16, #tpu.memory_space<vmem>>, vector<256x128xbf16>
    %cst_18 = arith.constant dense<0.000000e+00> : vector<8x128xf32>
    %24 = tpu.matmul %22, %23, %cst_18 {dimension_numbers = #tpu.dot_dimension_numbers<[1], [0], [0], [1], [0, 0, 1, 1], [], []>} : vector<8x256xbf16>, vector<256x128xbf16>, vector<8x128xf32> -> vector<8x128xf32>
    %25 = vector.broadcast %6 : vector<1x128xf32> to vector<8x128xf32>
    %26 = arith.addf %24, %25 : vector<8x128xf32>
    %cst_19 = arith.constant 0.000000e+00 : f32
    %27 = vector.broadcast %cst_19 : f32 to vector<8x128xf32>
    %28 = arith.maximumf %26, %27 : vector<8x128xf32>
    %29 = arith.truncf %28 : vector<8x128xf32> to vector<8x128xbf16>
    %c0_20 = arith.constant 0 : index
    %c0_21 = arith.constant 0 : index
    %30 = vector.load %arg6[%c0_20, %c0_21] : memref<128x128xbf16, #tpu.memory_space<vmem>>, vector<128x128xbf16>
    %cst_22 = arith.constant dense<0.000000e+00> : vector<8x128xf32>
    %31 = tpu.matmul %29, %30, %cst_22 {dimension_numbers = #tpu.dot_dimension_numbers<[1], [0], [0], [1], [0, 0, 1, 1], [], []>} : vector<8x128xbf16>, vector<128x128xbf16>, vector<8x128xf32> -> vector<8x128xf32>
    %32 = vector.broadcast %7 : vector<1x128xf32> to vector<8x128xf32>
    %33 = arith.addf %31, %32 : vector<8x128xf32>
    %cst_23 = arith.constant 0.000000e+00 : f32
    %34 = vector.broadcast %cst_23 : f32 to vector<8x128xf32>
    %35 = arith.maximumf %33, %34 : vector<8x128xf32>
    %36 = arith.truncf %35 : vector<8x128xf32> to vector<8x128xbf16>
    %c0_24 = arith.constant 0 : index
    %c0_25 = arith.constant 0 : index
    %37 = vector.load %arg7[%c0_24, %c0_25] : memref<128x128xbf16, #tpu.memory_space<vmem>>, vector<128x128xbf16>
    %cst_26 = arith.constant dense<0.000000e+00> : vector<8x128xf32>
    %38 = tpu.matmul %36, %37, %cst_26 {dimension_numbers = #tpu.dot_dimension_numbers<[1], [0], [0], [1], [0, 0, 1, 1], [], []>} : vector<8x128xbf16>, vector<128x128xbf16>, vector<8x128xf32> -> vector<8x128xf32>
    %39 = vector.broadcast %8 : vector<1x128xf32> to vector<8x128xf32>
    %40 = arith.addf %38, %39 : vector<8x128xf32>
    %cst_27 = arith.constant dense<0xFF800000> : vector<8xf32>
    %41 = vector.multi_reduction <maximumf>, %40, %cst_27 [1] : vector<8x128xf32> to vector<8xf32>
    %42 = vector.shape_cast %41 : vector<8xf32> to vector<8x1xf32>
    %43 = vector.broadcast %42 : vector<8x1xf32> to vector<8x128xf32>
    %44 = arith.subf %40, %43 : vector<8x128xf32>
    %45 = math.exp %44 : vector<8x128xf32>
    %c0_28 = arith.constant 0 : index
    %c0_29 = arith.constant 0 : index
    %46 = vector.load %arg9[%c0_28, %c0_29] : memref<128x8xf32, #tpu.memory_space<vmem>>, vector<128x8xf32>
    %cst_30 = arith.constant dense<0.000000e+00> : vector<8x8xf32>
    %47 = tpu.matmul %45, %46, %cst_30 {dimension_numbers = #tpu.dot_dimension_numbers<[1], [0], [0], [1], [0, 0, 1, 1], [], []>} : vector<8x128xf32>, vector<128x8xf32>, vector<8x8xf32> -> vector<8x8xf32>
    %48 = vector.extract_strided_slice %47 {offsets = [0, 2], sizes = [8, 1], strides = [1, 1]} : vector<8x8xf32> to vector<8x1xf32>
    %49 = tpu.reciprocal %48 {approx = true} : vector<8x1xf32> -> vector<8x1xf32>
    %50 = vector.broadcast %49 : vector<8x1xf32> to vector<8x8xf32>
    %51 = arith.mulf %47, %50 : vector<8x8xf32>
    %c0_31 = arith.constant 0 : index
    %c0_32 = arith.constant 0 : index
    %52 = vector.load %arg10[%c0_31, %c0_32] : memref<8x8xf32, #tpu.memory_space<vmem>>, vector<8x8xf32>
    tpu.vector_store %arg10[%c0_31, %c0_32], %51 {strides = array<i32>} : memref<8x8xf32, #tpu.memory_space<vmem>>, vector<8x8xf32>,
    return
  }
  func.func @transform_0(%arg0: i32) -> (i32, i32) {
    %c0_i32 = arith.constant 0 : i32
    %c0_i32_0 = arith.constant 0 : i32
    return %arg0, %c0_i32 : i32, i32
  }
  func.func @transform_1(%arg0: i32) -> (i32, i32) {
    %c0_i32 = arith.constant 0 : i32
    %c0_i32_0 = arith.constant 0 : i32
    return %arg0, %c0_i32 : i32, i32
  }
  func.func @transform_2(%arg0: i32) -> (i32, i32) {
    %c0_i32 = arith.constant 0 : i32
    %c0_i32_0 = arith.constant 0 : i32
    %c0_i32_1 = arith.constant 0 : i32
    return %c0_i32, %c0_i32_0 : i32, i32
  }
  func.func @transform_3(%arg0: i32) -> (i32, i32) {
    %c0_i32 = arith.constant 0 : i32
    %c0_i32_0 = arith.constant 0 : i32
    %c0_i32_1 = arith.constant 0 : i32
    return %c0_i32, %c0_i32_0 : i32, i32
  }
  func.func @transform_4(%arg0: i32) -> (i32, i32) {
    %c0_i32 = arith.constant 0 : i32
    %c0_i32_0 = arith.constant 0 : i32
    %c0_i32_1 = arith.constant 0 : i32
    return %c0_i32, %c0_i32_0 : i32, i32
  }
  func.func @transform_5(%arg0: i32) -> (i32, i32) {
    %c0_i32 = arith.constant 0 : i32
    %c0_i32_0 = arith.constant 0 : i32
    %c0_i32_1 = arith.constant 0 : i32
    return %c0_i32, %c0_i32_0 : i32, i32
  }
  func.func @transform_6(%arg0: i32) -> (i32, i32) {
    %c0_i32 = arith.constant 0 : i32
    %c0_i32_0 = arith.constant 0 : i32
    %c0_i32_1 = arith.constant 0 : i32
    return %c0_i32, %c0_i32_0 : i32, i32
  }
  func.func @transform_7(%arg0: i32) -> (i32, i32) {
    %c0_i32 = arith.constant 0 : i32
    %c0_i32_0 = arith.constant 0 : i32
    %c0_i32_1 = arith.constant 0 : i32
    return %c0_i32, %c0_i32_0 : i32, i32
  }
  func.func @transform_8(%arg0: i32) -> (i32, i32) {
    %c0_i32 = arith.constant 0 : i32
    %c0_i32_0 = arith.constant 0 : i32
    %c0_i32_1 = arith.constant 0 : i32
    return %c0_i32, %c0_i32_0 : i32, i32
  }
  func.func @transform_9(%arg0: i32) -> (i32, i32) {
    %c0_i32 = arith.constant 0 : i32
    %c0_i32_0 = arith.constant 0 : i32
    return %arg0, %c0_i32 : i32, i32
  }
}

</mosaic_0001>

<bundles_post_ra>
// kernel: img_controller_forward.1
= control target key start
LH: loop header
LB: loop body
LE: loop exit
PB: predicated region body
PF: predicated region fallthrough
CT: control target
= control target key end

     0   :  { %14 = vsyncpa [#allocation3], 0  ;;  %s1675_s0 = inlined_call_operand.vmem [shape: f32[8,64], index: 0, kind: input, shape index: {}]   ;;  %s1676_s1 = inlined_call_operand.vmem [shape: f32[8,64], index: 1, kind: input, shape index: {}]   ;;  %s1677_s2 = inlined_call_operand.vmem [shape: bf16[128,256], index: 2, kind: input, shape index: {}]   ;;  %s1678_s3 = inlined_call_operand.hbm [shape: bf16[256,256], index: 3, kind: input, shape index: {}]   ;;  %s1679_s4 = inlined_call_operand.hbm [shape: bf16[256,128], index: 4, kind: input, shape index: {}]   ;;  %s1680_s5 = inlined_call_operand.vmem [shape: bf16[128,128], index: 5, kind: input, shape index: {}]   ;;  %s1681_s6 = inlined_call_operand.hbm [shape: bf16[128,128], index: 6, kind: input, shape index: {}]   ;;  %s1682_s7 = inlined_call_operand.vmem [shape: f32[8,256], index: 7, kind: input, shape index: {}]   ;;  %s1683_s8 = inlined_call_operand.vmem [shape: f32[128,8], index: 8, kind: input, shape index: {}]   ;;  %s1684_s9 = inlined_call_operand.vmem [shape: f32[8,8], index: 9, kind: output, shape index: {}]  }
   0x1   :  { %15 = vsyncpa [#allocation5], 0  ;;  %s1404_s30 = smov [#allocation4]   ;;  %s1334_s13 = scalar_lea.hbm %s1679_s4, 2048 }
   0x2   :  { %s39_s10 = sshll.u32 %s1404_s30, 4  ;;  %p1335_p0 = scmp.ne.s32.totalorder %s1679_s4, %s1334_s13  ;;  %s40_s10 = int_to_ptr.vmem [resolvable:$true] %s39_s10 }
   0x3   :  { %p1338_p1 = scmp.lt.u32.totalorder %s1334_s13, %s1679_s4 }
   0x5   :  { %p1340_p2 = pnand %p1338_p1, %p1335_p0 }
   0x7   :  { %1343 = shalt.err (!%p1340_p2)
}
   0x8   :  { %s1344_s18 = scalar_lea.vmem %s40_s10, 2048  ;;  %p1349_p4 = scmp.lt.s32.totalorder %s40_s10, %s40_s10 }
   0x9   :  { %p1345_p3 = scmp.ne.s32.totalorder %s40_s10, %s1344_s18  ;;  %p1350_p5 = scmp.lt.s32.totalorder %s1344_s18, %s1344_s18 }
   0xb   :  { %p1351_p6 = por %p1350_p5, %p1349_p4 }
   0xd   :  { %p1352_p7 = pnand %p1351_p6, %p1345_p3 }
   0xf   :  { %1355 = shalt.err (!%p1352_p7)
}
  0x10   :  { %s1405_s19 = smov 64   ;;  %s1406_s20 = smov 4  }
  0x11   :  { %45 = dma.hbm_to_vmem [thread:$0]  %s1679_s4, 2048, %s40_s10, [#allocation5], %s1405_s19, %s1405_s19, %s1406_s20  }
  0x12   :  { %s1407_s23 = smov [#allocation2]   ;;  %s1356_s27 = scalar_lea.hbm %s1678_s3, 4096 }
  0x13   :  { %s27_s24 = sshll.u32 %s1407_s23, 4  ;;  %p1357_p8 = scmp.ne.s32.totalorder %s1678_s3, %s1356_s27  ;;  %s28_s24 = int_to_ptr.vmem [resolvable:$true] %s27_s24 }
  0x14   :  { %p1360_p9 = scmp.lt.u32.totalorder %s1356_s27, %s1678_s3 }
  0x16   :  { %p1362_p10 = pnand %p1360_p9, %p1357_p8 }
  0x18   :  { %1365 = shalt.err (!%p1362_p10)
}
  0x19   :  { %s1366_s12 = scalar_lea.vmem %s28_s24, 4096  ;;  %p1371_p12 = scmp.lt.s32.totalorder %s28_s24, %s28_s24 }
  0x1a   :  { %p1367_p11 = scmp.ne.s32.totalorder %s28_s24, %s1366_s12  ;;  %p1372_p13 = scmp.lt.s32.totalorder %s1366_s12, %s1366_s12 }
  0x1c   :  { %p1373_p0 = por %p1372_p13, %p1371_p12 }
  0x1e   :  { %p1374_p1 = pnand %p1373_p0, %p1367_p11 }
  0x20   :  { %1377 = shalt.err (!%p1374_p1)
}
  0x21   :  { %s1408_s4 = smov 128   ;;  %s1409_s10 = smov 8  }
  0x22   :  { %33 = dma.hbm_to_vmem [thread:$0]  %s1678_s3, 4096, %s28_s24, [#allocation3], %s1408_s4, %s1408_s4, %s1409_s10  }
  0x23   :  { %s1410_s15 = smov [#allocation6]   ;;  %s1378_s21 = scalar_lea.hbm %s1681_s6, 1024 }
  0x24   :  { %s53_s16 = sshll.u32 %s1410_s15, 4  ;;  %p1379_p2 = scmp.ne.s32.totalorder %s1681_s6, %s1378_s21  ;;  %s54_s16 = int_to_ptr.vmem [resolvable:$true] %s53_s16 }
  0x25   :  { %p1382_p3 = scmp.lt.u32.totalorder %s1378_s21, %s1681_s6 }
  0x27   :  { %p1384_p4 = pnand %p1382_p3, %p1379_p2 }
  0x29   :  { %1387 = shalt.err (!%p1384_p4)
}
  0x2a   :  { %s1388_s27 = scalar_lea.vmem %s54_s16, 1024  ;;  %p1393_p6 = scmp.lt.s32.totalorder %s54_s16, %s54_s16 }
  0x2b   :  { %p1389_p5 = scmp.ne.s32.totalorder %s54_s16, %s1388_s27  ;;  %p1394_p7 = scmp.lt.s32.totalorder %s1388_s27, %s1388_s27 }
  0x2d   :  { %p1395_p8 = por %p1394_p7, %p1393_p6 }
  0x2f   :  { %p1396_p9 = pnand %p1395_p8, %p1389_p5 }
  0x31   :  { %1399 = shalt.err (!%p1396_p9)
}
  0x32   :  { %59 = dma.hbm_to_vmem [thread:$0]  %s1681_s6, 1024, %s54_s16, [#allocation5], %s1405_s19, %s1405_s19, %s1406_s20  }
  0x33   :  { %1400 = dma.done.wait [#allocation3], 4096  }
  0x34   :  { %1401 = vsyncadd [#allocation3], 4294963200 }
  0x35   :  { %1402 = dma.done.wait [#allocation5], 3072  }
  0x36   :  { %1403 = vsyncadd [#allocation5], 4294964224  ;;  %v1411_v0 = vmov 0   ;;  %v75_v1 = vld [vmem:[%s1676_s1] sm:$0xff]  ;;  %v1229_v4 = vld [vmem:[%s1677_s2 + $0x14] ss:$8 sps:$4 sm:$0xff]  }
  0x37   :  { %228 = vmatprep.mubr.bf16.mxu0 %v1411_v0  ;;  %77 = vrot.lane.b32.xlu0 %v75_v1, %s1405_s19  ;;  %v1226_v2 = vld [vmem:[%s1677_s2 + $0x4] ss:$8 sps:$4 sm:$0xff]   ;;  %v1228_v3 = vld [vmem:[%s1677_s2] ss:$8 sps:$4 sm:$0xff]   ;;  %v1231_v5 = vld [vmem:[%s1677_s2 + $0x10] ss:$8 sps:$4 sm:$0xff]  }
  0x38   :  { %196 = vmatprep.subr.bf16.mxu0 %v1226_v2  ;;  %v1232_v6 = vld [vmem:[%s1677_s2 + $0x24] ss:$8 sps:$4 sm:$0xff]   ;;  %v1234_v7 = vld [vmem:[%s1677_s2 + $0x20] ss:$8 sps:$4 sm:$0xff]   ;;  %v1235_v8 = vld [vmem:[%s1677_s2 + $0x34] ss:$8 sps:$4 sm:$0xff]   ;;  %v106_v2 = vlaneseq }
  0x39   :  { %197 = vmatpush1.bf16.msra.mxu0 %v1228_v3  ;;  %v1237_v9 = vld [vmem:[%s1677_s2 + $0x30] ss:$8 sps:$4 sm:$0xff]   ;;  %v1250_v10 = vld [vmem:[#allocation2 + $0x4] ss:$8 sps:$4 sm:$0xff]   ;;  %v1253_v13 = vld [vmem:[#allocation2 + $0x14] ss:$8 sps:$4 sm:$0xff]  }
  0x3a   :  { %198 = vmatprep.subr.bf16.mxu0 %v1229_v4  ;;  %v1252_v11 = vld [vmem:[#allocation2] ss:$8 sps:$4 sm:$0xff]   ;;  %v1238_v12 = vld [vmem:[%s1677_s2 + $0x44] ss:$8 sps:$4 sm:$0xff]   ;;  %444 = vmatprep.subr.bf16.mxu1 %v1250_v10  ;;  %v1255_v14 = vld [vmem:[#allocation2 + $0x10] ss:$8 sps:$4 sm:$0xff]  }
  0x3b   :  { %445 = vmatpush1.bf16.msra.mxu1 %v1252_v11  ;;  %v1240_v15 = vld [vmem:[%s1677_s2 + $0x40] ss:$8 sps:$4 sm:$0xff]   ;;  %v1256_v16 = vld [vmem:[#allocation2 + $0x24] ss:$8 sps:$4 sm:$0xff]   ;;  %v1243_v19 = vld [vmem:[%s1677_s2 + $0x50] ss:$8 sps:$4 sm:$0xff]  }
  0x3c   :  { %446 = vmatprep.subr.bf16.mxu1 %v1253_v13  ;;  %v1241_v17 = vld [vmem:[%s1677_s2 + $0x54] ss:$8 sps:$4 sm:$0xff]   ;;  %v1258_v18 = vld [vmem:[#allocation2 + $0x20] ss:$8 sps:$4 sm:$0xff]   ;;  %v1244_v21 = vld [vmem:[%s1677_s2 + $0x64] ss:$8 sps:$4 sm:$0xff]  }
  0x3d   :  { %199 = vmatpush1.bf16.msra.mxu0 %v1231_v5  ;;  %v1259_v20 = vld [vmem:[#allocation2 + $0x34] ss:$8 sps:$4 sm:$0xff]   ;;  %v1261_v22 = vld [vmem:[#allocation2 + $0x30] ss:$8 sps:$4 sm:$0xff]   ;;  %v1262_v24 = vld [vmem:[#allocation2 + $0x44] ss:$8 sps:$4 sm:$0xff]  }
  0x3e   :  { %200 = vmatprep.subr.bf16.mxu0 %v1232_v6  ;;  %v1246_v23 = vld [vmem:[%s1677_s2 + $0x60] ss:$8 sps:$4 sm:$0xff]   ;;  %v1247_v25 = vld [vmem:[%s1677_s2 + $0x74] ss:$8 sps:$4 sm:$0xff]   ;;  %v1249_v27 = vld [vmem:[%s1677_s2 + $0x70] ss:$8 sps:$4 sm:$0xff]  }
  0x3f   :  { %447 = vmatpush1.bf16.msra.mxu1 %v1255_v14  ;;  %v1264_v26 = vld [vmem:[#allocation2 + $0x40] ss:$8 sps:$4 sm:$0xff]   ;;  %v1265_v28 = vld [vmem:[#allocation2 + $0x54] ss:$8 sps:$4 sm:$0xff]   ;;  %v1267_v29 = vld [vmem:[#allocation2 + $0x50] ss:$8 sps:$4 sm:$0xff]  }
  0x40   :  { %448 = vmatprep.subr.bf16.mxu1 %v1256_v16  ;;  %v1268_v30 = vld [vmem:[#allocation2 + $0x64] ss:$8 sps:$4 sm:$0xff]   ;;  %v1270_v31 = vld [vmem:[#allocation2 + $0x60] ss:$8 sps:$4 sm:$0xff]   ;;  %v1271_v32 = vld [vmem:[#allocation2 + $0x74] ss:$8 sps:$4 sm:$0xff]  }
  0x41   :  { %201 = vmatpush1.bf16.msra.mxu0 %v1234_v7  ;;  %v1273_v33 = vld [vmem:[#allocation2 + $0x70] ss:$8 sps:$4 sm:$0xff]   ;;  %v1274_v34 = vld [vmem:[#allocation2 + $0x84] ss:$8 sps:$4 sm:$0xff]   ;;  %v1276_v35 = vld [vmem:[#allocation2 + $0x80] ss:$8 sps:$4 sm:$0xff]  }
  0x42   :  { %202 = vmatprep.subr.bf16.mxu0 %v1235_v8  ;;  %v1277_v36 = vld [vmem:[#allocation2 + $0x94] ss:$8 sps:$4 sm:$0xff]   ;;  %v1279_v37 = vld [vmem:[#allocation2 + $0x90] ss:$8 sps:$4 sm:$0xff]   ;;  %v1280_v38 = vld [vmem:[#allocation2 + $0xa4] ss:$8 sps:$4 sm:$0xff]  }
  0x43   :  { %449 = vmatpush1.bf16.msra.mxu1 %v1258_v18  ;;  %v1282_v39 = vld [vmem:[#allocation2 + $0xa0] ss:$8 sps:$4 sm:$0xff]   ;;  %v1283_v40 = vld [vmem:[#allocation2 + $0xb4] ss:$8 sps:$4 sm:$0xff]   ;;  %v1285_v41 = vld [vmem:[#allocation2 + $0xb0] ss:$8 sps:$4 sm:$0xff]  }
  0x44   :  { %450 = vmatprep.subr.bf16.mxu1 %v1259_v20  ;;  %v1286_v42 = vld [vmem:[#allocation2 + $0xc4] ss:$8 sps:$4 sm:$0xff]   ;;  %v1288_v43 = vld [vmem:[#allocation2 + $0xc0] ss:$8 sps:$4 sm:$0xff]   ;;  %v1289_v44 = vld [vmem:[#allocation2 + $0xd4] ss:$8 sps:$4 sm:$0xff]  }
  0x45   :  { %203 = vmatpush1.bf16.msra.mxu0 %v1237_v9  ;;  %v1291_v45 = vld [vmem:[#allocation2 + $0xd0] ss:$8 sps:$4 sm:$0xff]   ;;  %vm80_vm0 = vcmask 523264   ;;  %v1292_v50 = vld [vmem:[#allocation2 + $0xe4] ss:$8 sps:$4 sm:$0xff]   ;;  %v107_v3 = vshrl.u32 %v106_v2, 7 }
  0x46   :  { %204 = vmatprep.subr.bf16.mxu0 %v1238_v12  ;;  %v74_v46 = vld [vmem:[%s1675_s0] sm:$0xff]  ;;  %v1294_v51 = vld [vmem:[#allocation2 + $0xe0] ss:$8 sps:$4 sm:$0xff]   ;;  %v1302_v58 = vld [vmem:[#allocation4 + $0x50] sm:$0xff]   ;;  %vm1413_vm1 = vmmov 0   ;;  %vm967_vm2 = vcmask 64512  }
  0x47   :  { %451 = vmatpush1.bf16.msra.mxu1 %v1261_v22  ;;  %v1295_v52 = vld [vmem:[#allocation2 + $0xf4] ss:$8 sps:$4 sm:$0xff]   ;;  %v1297_v53 = vld [vmem:[#allocation2 + $0xf0] ss:$8 sps:$4 sm:$0xff]   ;;  %v1298_v54 = vld [vmem:[#allocation4 + $0x40] sm:$0xff]   ;;  %v108_v4 = vsub.s32 0, %v107_v3 }
  0x48   :  { %452 = vmatprep.subr.bf16.mxu1 %v1262_v24  ;;  %v1299_v55 = vld [vmem:[#allocation4] sm:$0xff]   ;;  %v1300_v56 = vld [vmem:[#allocation4 + $0x48] sm:$0xff]   ;;  %v1303_v59 = vld [vmem:[#allocation4 + $0x10] sm:$0xff]   ;;  %v112_v6 = vsub.s32 1, %v107_v3 }
  0x49   :  { %205 = vmatpush1.bf16.msra.mxu0 %v1240_v15  ;;  %v1301_v57 = vld [vmem:[#allocation4 + $0x8] sm:$0xff]   ;;  %v1304_v60 = vld [vmem:[#allocation4 + $0x58] sm:$0xff]   ;;  %v1306_v62 = vld [vmem:[#allocation4 + $0x60] sm:$0xff]  }
  0x4a   :  { %206 = vmatprep.subr.bf16.mxu0 %v1241_v17  ;;  %v1305_v61 = vld [vmem:[#allocation4 + $0x18] sm:$0xff]   ;;  %v1307_v63 = vld [vmem:[#allocation4 + $0x20] sm:$0xff]   ;;  %v1308_v0 = vld [vmem:[#allocation4 + $0x68] sm:$0xff]  }
  0x4b   :  { %453 = vmatpush1.bf16.msra.mxu1 %v1264_v26  ;;  %v1309_v1 = vld [vmem:[#allocation4 + $0x28] sm:$0xff]   ;;  %v83_v5 = vld [vmem:[%s1682_s7] ss:$8 sm:$0x3]  ;;  %v1311_v20 = vld [vmem:[#allocation4 + $0x30] sm:$0xff]  }
  0x4c   :  { %454 = vmatprep.subr.bf16.mxu1 %v1265_v28  ;;  %v109_v7 = vrot.slane %v83_v5, %v108_v4  ;;  %v113_v8 = vrot.slane %v83_v5, %v112_v6  ;;  %v1313_v22 = vld [vmem:[#allocation4 + $0x38] sm:$0xff]  }
  0x4d   :  { %207 = vmatpush1.bf16.msra.mxu0 %v1243_v19  ;;  %v1310_v19 = vld [vmem:[#allocation4 + $0x70] sm:$0xff]   ;;  %v975_v24 = vld [vmem:[%s1682_s7 + $0x1] ss:$8 sm:$0x3] }
  0x4e   :  { %208 = vmatprep.subr.bf16.mxu0 %v1244_v21  ;;  %v1312_v21 = vld [vmem:[#allocation4 + $0x78] sm:$0xff]   ;;  %v281_v26 = vrot.slane %v975_v24, %v112_v6 }
  0x4f   :  { %455 = vmatpush1.bf16.msra.mxu1 %v1267_v29  ;;  %v874_v6 = vld [vmem:[%s1683_s8] sm:$0xff] }
  0x50   :  { %456 = vmatprep.subr.bf16.mxu1 %v1268_v30 }
  0x51   :  { %209 = vmatpush1.bf16.msra.mxu0 %v1246_v23  ;;  %v1412_v23 = vmov 0.0  }
  0x52   :  { %210 = vmatprep.subr.bf16.mxu0 %v1247_v25  ;;  %v277_v25 = vrot.slane %v975_v24, %v108_v4 }
  0x53   :  { %457 = vmatpush1.bf16.msra.mxu1 %v1270_v31 }
  0x54   :  { %458 = vmatprep.subr.bf16.mxu1 %v1271_v32 }
  0x55   :  { %211 = vmatpush1.bf16.msra.mxu0 %v1249_v27 }
  0x56   :  { %1056 = vmatprep.subr.bf16.mxu0 %v1298_v54 }
  0x57   :  { %459 = vmatpush1.bf16.msra.mxu1 %v1273_v33 }
  0x58   :  { %460 = vmatprep.subr.bf16.mxu1 %v1274_v34 }
  0x5b   :  { %461 = vmatpush1.bf16.msra.mxu1 %v1276_v35 }
  0x5c   :  { %462 = vmatprep.subr.bf16.mxu1 %v1277_v36  ;;  %v1314_v36 = vld [vmem:[%s1680_s5] sm:$0xff]  }
  0x5f   :  { %463 = vmatpush1.bf16.msra.mxu1 %v1279_v37 }
  0x60   :  { %464 = vmatprep.subr.bf16.mxu1 %v1280_v38  ;;  %v1315_v38 = vld [vmem:[%s1680_s5 + $0x8] sm:$0xff]  }
  0x63   :  { %465 = vmatpush1.bf16.msra.mxu1 %v1282_v39  ;;  %v1316_v39 = vld [vmem:[%s1680_s5 + $0x10] sm:$0xff]  }
  0x64   :  { %466 = vmatprep.subr.bf16.mxu1 %v1283_v40  ;;  %v1317_v40 = vld [vmem:[%s1680_s5 + $0x18] sm:$0xff]  }
  0x67   :  { %467 = vmatpush1.bf16.msra.mxu1 %v1285_v41  ;;  %v1318_v41 = vld [vmem:[%s1680_s5 + $0x20] sm:$0xff]  }
  0x68   :  { %468 = vmatprep.subr.bf16.mxu1 %v1286_v42  ;;  %v1319_v42 = vld [vmem:[%s1680_s5 + $0x28] sm:$0xff]  }
  0x6b   :  { %469 = vmatpush1.bf16.msra.mxu1 %v1288_v43  ;;  %v1320_v43 = vld [vmem:[%s1680_s5 + $0x30] sm:$0xff]  }
  0x6c   :  { %470 = vmatprep.subr.bf16.mxu1 %v1289_v44  ;;  %v1321_v44 = vld [vmem:[%s1680_s5 + $0x38] sm:$0xff]  }
  0x6f   :  { %471 = vmatpush1.bf16.msra.mxu1 %v1291_v45  ;;  %v1322_v45 = vld [vmem:[#allocation6] sm:$0xff]  }
  0x70   :  { %472 = vmatprep.subr.bf16.mxu1 %v1292_v50  ;;  %v1327_v50 = vld [vmem:[#allocation6 + $0x28] sm:$0xff]  }
  0x73   :  { %473 = vmatpush1.bf16.msra.mxu1 %v1294_v51 }
  0x74   :  { %474 = vmatprep.subr.bf16.mxu1 %v1295_v52  ;;  %v86_v52 = vld [vmem:[%s1682_s7 + $0x2] ss:$0 sm:$0xff] }
  0x77   :  { %475 = vmatpush1.bf16.msra.mxu1 %v1297_v53 }
  0x78   :  { %1133 = vmatprep.subr.bf16.mxu1 %v1412_v23 }
  0xa9   :  { %v78_v47 = vpop.permute.xlu0 %77 }
  0xaa   :  { %v81_v48 = vsel %vm80_vm0, %v74_v46, %v78_v47  ;;  %v1323_v46 = vld [vmem:[#allocation6 + $0x8] sm:$0xff]   ;;  %v1324_v47 = vld [vmem:[#allocation6 + $0x10] sm:$0xff]  }
  0xab   :  { %v82_v49 = vpack.c.bf16 %v81_v48, %v81_v48  ;;  %v1325_v48 = vld [vmem:[#allocation6 + $0x18] sm:$0xff]  }
  0xad   :  { %229 = vmatmul.mubr.bf16.vlgmr.msra.gmra.mrb[0].mxu0 %v82_v49  ;;  %v1326_v49 = vld [vmem:[#allocation6 + $0x20] sm:$0xff]  }
  0xae   :  { %1057 = vmatpush3.bf16.msra.mxu0 %v1299_v55 }
  0xaf   :  { %1058 = vmatprep.subr.bf16.mxu0 %v1300_v56 }
  0xb2   :  { %1059 = vmatpush3.bf16.msra.mxu0 %v1301_v57 }
  0xb3   :  { %1060 = vmatprep.subr.bf16.mxu0 %v1302_v58 }
  0xb6   :  { %1061 = vmatpush3.bf16.msra.mxu0 %v1303_v59 }
  0xb7   :  { %1062 = vmatprep.subr.bf16.mxu0 %v1304_v60  ;;  %v1328_v60 = vld [vmem:[#allocation6 + $0x30] sm:$0xff]  }
  0xba   :  { %1063 = vmatpush3.bf16.msra.mxu0 %v1305_v61  ;;  %v1329_v61 = vld [vmem:[#allocation6 + $0x38] sm:$0xff]  }
  0xbb   :  { %1064 = vmatprep.subr.bf16.mxu0 %v1306_v62  ;;  %v87_v62 = vld [vmem:[%s1682_s7 + $0x3] ss:$0 sm:$0xff] }
  0xbe   :  { %1065 = vmatpush3.bf16.msra.mxu0 %v1307_v63 }
  0xbf   :  { %1066 = vmatprep.subr.bf16.mxu0 %v1308_v0 }
  0xc2   :  { %1067 = vmatpush3.bf16.msra.mxu0 %v1309_v1 }
  0xc3   :  { %1068 = vmatprep.subr.bf16.mxu0 %v1310_v19  ;;  %v88_v19 = vld [vmem:[%s1682_s7 + $0x4] ss:$0 sm:$0xff] }
  0xc6   :  { %1069 = vmatpush3.bf16.msra.mxu0 %v1311_v20 }
  0xc7   :  { %1070 = vmatprep.subr.bf16.mxu0 %v1312_v21 }
  0xca   :  { %1071 = vmatpush3.bf16.msra.mxu0 %v1313_v22 }
  0xcb   :  { %1113 = vmatprep.subr.bf16.mxu0 %v1412_v23 }
 0x180   :  { %v230_v9 = vpop.f32.mrb[0].mxu0 }
 0x181   :  { %v231_v10 = vadd.f32 %v230_v9, %v109_v7  ;;  %v232_v11 = vpop.f32.mrb[1].mxu0  ;;  %v875_v7 = vld [vmem:[%s1683_s8 + $0x8] sm:$0xff]  ;;  %v1414_v9 = vmov 0.0|0.0  }
 0x182   :  { %v233_v12 = vadd.f32 %v232_v11, %v113_v8  ;;  %v234_v13 = vpop.f32.mrb[2].mxu0  ;;  %v876_v8 = vld [vmem:[%s1683_s8 + $0x10] sm:$0xff]  ;;  %v877_v11 = vld [vmem:[%s1683_s8 + $0x18] sm:$0xff] }
 0x183   :  { %v237_v14 = vmax.f32 %v231_v10, 0.0  ;;  %v235_v15 = vpop.f32.mrb[3].mxu0  ;;  %v1189_v10 = vpack.c.bf16 %v875_v7, %v874_v6  ;;  %v878_v13 = vld [vmem:[%s1683_s8 + $0x20] sm:$0xff] }
 0x184   :  { %v238_v16 = vmax.f32 %v233_v12, 0.0  ;;  %v1192_v12 = vpack.c.bf16 %v877_v11, %v876_v8 }
 0x185   :  { %v239_v18 = vpack.c.bf16 %v237_v14, %v237_v14  ;;  %v879_v14 = vld [vmem:[%s1683_s8 + $0x28] sm:$0xff] }
 0x186   :  { %v240_v17 = vpack.c.bf16 %v238_v16, %v238_v16  ;;  %v1195_v15 = vpack.c.bf16 %v879_v14, %v878_v13  ;;  %v880_v16 = vld [vmem:[%s1683_s8 + $0x30] sm:$0xff] }
 0x188   :  { %476 = vmatprep.mubr.bf16.mxu1 %v240_v17  ;;  %v881_v17 = vld [vmem:[%s1683_s8 + $0x38] sm:$0xff] }
 0x189   :  { %477 = vmatmul.mubr.bf16.vlgmr.msra.gmra.mrb[0].mxu1 %v239_v18  ;;  %v1198_v18 = vpack.c.bf16 %v881_v17, %v880_v16 }
 0x18a   :  { %1149 = vmatprep.mubr.msk.bf16.mxu1 %vm1413_vm1, %v1412_v23  ;;  %1134 = vmatpush3.bf16.msra.mxu1 %v1322_v45 }
 0x18b   :  { %1135 = vmatprep.subr.bf16.mxu1 %v1412_v23 }
 0x18e   :  { %1136 = vmatpush3.bf16.msra.mxu1 %v1323_v46 }
 0x18f   :  { %1137 = vmatprep.subr.bf16.mxu1 %v1412_v23 }
 0x192   :  { %1138 = vmatpush3.bf16.msra.mxu1 %v1324_v47 }
 0x193   :  { %1139 = vmatprep.subr.bf16.mxu1 %v1412_v23 }
 0x196   :  { %1140 = vmatpush3.bf16.msra.mxu1 %v1325_v48 }
 0x197   :  { %1141 = vmatprep.subr.bf16.mxu1 %v1412_v23 }
 0x19a   :  { %1142 = vmatpush3.bf16.msra.mxu1 %v1326_v49 }
 0x19b   :  { %1143 = vmatprep.subr.bf16.mxu1 %v1412_v23 }
 0x19e   :  { %1144 = vmatpush3.bf16.msra.mxu1 %v1327_v50 }
 0x19f   :  { %1145 = vmatprep.subr.bf16.mxu1 %v1412_v23 }
 0x1a2   :  { %1146 = vmatpush3.bf16.msra.mxu1 %v1328_v60 }
 0x1a3   :  { %1147 = vmatprep.subr.bf16.mxu1 %v1412_v23 }
 0x1a6   :  { %1148 = vmatpush3.bf16.msra.mxu1 %v1329_v61 }
 0x25c   :  { %v478_v27 = vpop.f32.mrb[0].mxu1 }
 0x25d   :  { %v479_v28 = vadd.f32 %v478_v27, %v277_v25  ;;  %v480_v29 = vpop.f32.mrb[1].mxu1  ;;  %v882_v25 = vld [vmem:[%s1683_s8 + $0x40] sm:$0xff] }
 0x25e   :  { %v481_v30 = vadd.f32 %v480_v29, %v281_v26  ;;  %v482_v31 = vpop.f32.mrb[2].mxu1  ;;  %v883_v26 = vld [vmem:[%s1683_s8 + $0x48] sm:$0xff]  ;;  %v885_v29 = vld [vmem:[%s1683_s8 + $0x58] sm:$0xff] }
 0x25f   :  { %v485_v32 = vmax.f32 %v479_v28, 0.0  ;;  %v483_v33 = vpop.f32.mrb[3].mxu1  ;;  %v1201_v27 = vpack.c.bf16 %v883_v26, %v882_v25  ;;  %v884_v28 = vld [vmem:[%s1683_s8 + $0x50] sm:$0xff]  ;;  %v886_v31 = vld [vmem:[%s1683_s8 + $0x60] sm:$0xff] }
 0x260   :  { %v486_v34 = vmax.f32 %v481_v30, 0.0  ;;  %v1204_v30 = vpack.c.bf16 %v885_v29, %v884_v28 }
 0x261   :  { %v487_v37 = vpack.c.bf16 %v485_v32, %v485_v32  ;;  %v887_v32 = vld [vmem:[%s1683_s8 + $0x68] sm:$0xff] }
 0x262   :  { %v488_v35 = vpack.c.bf16 %v486_v34, %v486_v34  ;;  %v1207_v33 = vpack.c.bf16 %v887_v32, %v886_v31  ;;  %v888_v34 = vld [vmem:[%s1683_s8 + $0x70] sm:$0xff] }
 0x264   :  { %649 = vmatprep.mubr.bf16.mxu0 %v488_v35  ;;  %v889_v35 = vld [vmem:[%s1683_s8 + $0x78] sm:$0xff] }
 0x265   :  { %650 = vmatmul.mubr.bf16.vlgmr.msra.gmra.mrb[4].mxu0 %v487_v37 }
 0x266   :  { %1114 = vmatpush3.bf16.msra.mxu0 %v1314_v36  ;;  %1129 = vmatprep.mubr.msk.bf16.mxu0 %vm1413_vm1, %v1412_v23  ;;  %v1210_v36 = vpack.c.bf16 %v889_v35, %v888_v34 }
 0x267   :  { %1115 = vmatprep.subr.bf16.mxu0 %v1412_v23 }
 0x26a   :  { %1116 = vmatpush3.bf16.msra.mxu0 %v1315_v38 }
 0x26b   :  { %1117 = vmatprep.subr.bf16.mxu0 %v1412_v23 }
 0x26e   :  { %1118 = vmatpush3.bf16.msra.mxu0 %v1316_v39 }
 0x26f   :  { %1119 = vmatprep.subr.bf16.mxu0 %v1412_v23 }
 0x272   :  { %1120 = vmatpush3.bf16.msra.mxu0 %v1317_v40 }
 0x273   :  { %1121 = vmatprep.subr.bf16.mxu0 %v1412_v23 }
 0x276   :  { %1122 = vmatpush3.bf16.msra.mxu0 %v1318_v41  ;;  %v1415_v41 = vmov 2  }
 0x277   :  { %1123 = vmatprep.subr.bf16.mxu0 %v1412_v23  ;;  %1224 = vset.pattern.permute.xlu1 %v1415_v41 }
 0x278   :  { %1225 = vset.pattern.permute.xlu0 %v1415_v41 }
 0x27a   :  { %1124 = vmatpush3.bf16.msra.mxu0 %v1319_v42 }
 0x27b   :  { %1125 = vmatprep.subr.bf16.mxu0 %v1412_v23 }
 0x27e   :  { %1126 = vmatpush3.bf16.msra.mxu0 %v1320_v43 }
 0x27f   :  { %1127 = vmatprep.subr.bf16.mxu0 %v1412_v23 }
 0x282   :  { %1128 = vmatpush3.bf16.msra.mxu0 %v1321_v44 }
 0x283   :  { %1188 = vmatprep.subr.bf16.mxu0 %v1414_v9 }
 0x338   :  { %v1072_v51 = vpop.f32.mrb[4].mxu0 }
 0x339   :  { %v1073_v53 = vpop.f32.mrb[5].mxu0 }
 0x33a   :  { %v1074_v54 = vadd.f32 %v1073_v53, %v1072_v51  ;;  %v1075_v55 = vpop.f32.mrb[6].mxu0 }
 0x33b   :  { %v1076_v56 = vpop.f32.mrb[7].mxu0 }
 0x33c   :  { %v652_v57 = vadd.f32 %v1074_v54, %v86_v52 }
 0x33e   :  { %v657_v58 = vmax.f32 %v652_v57, 0.0 }
 0x340   :  { %v658_v59 = vpack.c.bf16 %v657_v58, %v657_v58 }
 0x342   :  { %1130 = vmatmul.mubr.bf16.vlgmr.msra.gmra.mrb[8].mxu0 %v658_v59 }
 0x343   :  { %1185 = vmatprep.mubr.msk.f32.mxu0 %vm1413_vm1, %v1412_v23  ;;  %1190 = vmatpush3.bf16.msra.mxu0 %v1189_v10 }
 0x344   :  { %1191 = vmatprep.subr.bf16.mxu0 %v1414_v9 }
 0x347   :  { %1193 = vmatpush3.bf16.msra.mxu0 %v1192_v12 }
 0x348   :  { %1194 = vmatprep.subr.bf16.mxu0 %v1414_v9 }
 0x34b   :  { %1196 = vmatpush3.bf16.msra.mxu0 %v1195_v15 }
 0x34c   :  { %1197 = vmatprep.subr.bf16.mxu0 %v1414_v9 }
 0x34f   :  { %1199 = vmatpush3.bf16.msra.mxu0 %v1198_v18 }
 0x350   :  { %1200 = vmatprep.subr.bf16.mxu0 %v1414_v9 }
 0x353   :  { %1202 = vmatpush3.bf16.msra.mxu0 %v1201_v27 }
 0x354   :  { %1203 = vmatprep.subr.bf16.mxu0 %v1414_v9 }
 0x357   :  { %1205 = vmatpush3.bf16.msra.mxu0 %v1204_v30 }
 0x358   :  { %1206 = vmatprep.subr.bf16.mxu0 %v1414_v9 }
 0x35b   :  { %1208 = vmatpush3.bf16.msra.mxu0 %v1207_v33 }
 0x35c   :  { %1209 = vmatprep.subr.bf16.mxu0 %v1414_v9 }
 0x35f   :  { %1211 = vmatpush3.bf16.msra.mxu0 %v1210_v36 }
 0x415   :  { %v757_v63 = vpop.f32.mrb[8].mxu0 }
 0x416   :  { %v758_v0 = vadd.f32 %v757_v63, %v87_v62  ;;  %v1131_v1 = vpop.f32.mrb[9].mxu0 }
 0x417   :  { %v760_v2 = vpop.f32.mrb[10].mxu0 }
 0x418   :  { %v763_v3 = vmax.f32 %v758_v0, 0.0  ;;  %v1132_v4 = vpop.f32.mrb[11].mxu0 }
 0x41a   :  { %v764_v5 = vpack.c.bf16 %v763_v3, %v763_v3 }
 0x41c   :  { %1150 = vmatmul.mubr.bf16.vlgmr.msra.gmra.mrb[4].mxu1 %v764_v5 }
 0x4ef   :  { %v863_v20 = vpop.f32.mrb[4].mxu1 }
 0x4f0   :  { %v864_v21 = vadd.f32 %v863_v20, %v88_v19  ;;  %v1151_v22 = vpop.f32.mrb[5].mxu1 }
 0x4f1   :  { %v866_v23 = vpop.f32.mrb[6].mxu1 }
 0x4f2   :  { %869 = vmax.xlane.f32.xlu0 %v864_v21  ;;  %v1152_v24 = vpop.f32.mrb[7].mxu1 }
 0x57f   :  { %v870_v37 = vpop.xlane.xlu0 %869 }
 0x580   :  { %v871_v38 = vsub.f32 %v864_v21, %v870_v37 }
 0x582   :  { %v872_v39 = vmul.f32 1.442695, %v871_v38 }
 0x584   :  { %1330 = vpow2.f32 %v872_v39 }
 0x58e   :  { %v1331_v40 = vpop.eup %1330 }
 0x58f   :  { %1186 = vmatmul.mubr.f32.vlgmr.msra.gmra.mrb[12].mxu0 %v1331_v40 }
 0x662   :  { %v956_v42 = vpop.f32.mrb[12].mxu0 }
 0x663   :  { %1332 = vrcp.f32 %v956_v42  ;;  %v1187_v43 = vpop.f32.mrb[13].mxu0 }
 0x66d   :  { %v1333_v44 = vpop.eup %1332 }
 0x66e   :  { %963 = vperm.xlu1 %1224, %v1333_v44  }
 0x6ed   :  { %v964_v45 = vpop.permute.xlu1 %963 }
 0x6ee   :  { %v966_v46 = vmul.f32 %v964_v45, %v956_v42 }
 0x6f0   :  { %968 = vst.msk [vmem:[%s1684_s9] sm:$0xff] %vm967_vm2, %v966_v46 }
 0x6f1   :  { %973 = vsyncpa [#allocation3], 1 }
 0x6f2   :  { %974 = vsyncpa [#allocation5], 1 }

</bundles_post_ra>
